<compile_context>
chip_gen: v5e
topology: v5e:2x2
jax: 0.10.0
libtpu: 0.0.40
codegen_flags: <defaults>
</compile_context>

<pallas_src>
import math

import jax
import jax.numpy as jnp
from jax.experimental import pallas as pl
from jax.experimental.pallas import tpu as pltpu


def _layer_scale_kernel(x_ref, gamma_ref, o_ref):
    # Elementwise VPU multiply; dtype promotion/cast happens here (free — the kernel is
    # HBM-DMA bound), never as a separate XLA pass in the wrapper.
    o_ref[...] = (x_ref[...] * gamma_ref[...]).astype(o_ref.dtype)


def _tpu_tuning():
    """Return (target_tile_bytes, is_multi_tensorcore) for the local TPU generation."""
    try:
        kind = jax.devices()[0].device_kind.lower()
    except Exception:
        return 4 << 20, False
    if "v7" in kind:
        # ~3.2 TB/s HBM: need ~8 MiB tiles so the ~0.35 us per-step overhead is <10%.
        return 8 << 20, True
    if "v6" in kind:
        return 6 << 20, False
    if "v5" in kind or "v4" in kind or "lite" in kind:
        # ~0.8 TB/s: 2 MiB tiles are already ~93% of roofline; bigger buys nothing.
        return 2 << 20, False
    return 4 << 20, False


def layer_scale(x: jax.Array, gamma: jax.Array, *, target_tile_bytes: int | None = None) -> jax.Array:
    """x: (..., D), gamma: (D,). Returns x * gamma (broadcast over the last dim)."""
    orig_shape = x.shape
    D = orig_shape[-1]
    assert gamma.shape == (D,)

    # Match PyTorch promotion semantics (x * gamma upcasts if dtypes differ). The cast
    # itself is done inside the kernel; here we only pick the output dtype.
    out_dtype = jnp.result_type(x.dtype, gamma.dtype)
    if x.size == 0:
        return jnp.zeros(orig_shape, out_dtype)

    auto_tile, is_multicore = _tpu_tuning()
    if target_tile_bytes is None:
        target_tile_bytes = auto_tile

    x_item = jnp.dtype(x.dtype).itemsize
    g_item = jnp.dtype(gamma.dtype).itemsize
    out_item = jnp.dtype(out_dtype).itemsize
    max_item = max(x_item, out_item)
    min_item = min(x_item, out_item)
    # Sublane packing of the narrowest streamed dtype: f32 -> 8 rows/vreg, bf16 -> 16,
    # int8/fp8 -> 32. Row tiles aligned to this keep x and out tiles on native boundaries.
    row_align = 8 * max(1, 4 // min_item)

    x2 = x.reshape(-1, D)          # free (contiguous) reshape
    g2 = gamma
    R = x2.shape[0]

    # ---- lane-dense fold: fold k consecutive rows into the lane axis --------------------
    # Full fold (k = 128/gcd(D,128)) makes every store a full-width vst; when R % k != 0 we
    # still fold by the largest divisor of R <= k (partial lane densification, zero copies).
    if D % 128 != 0:
        k_full = 128 // math.gcd(D, 128)
        k_cap = max(1, target_tile_bytes // max(1, row_align * D * max_item))
        k = 1
        for cand in range(min(k_full, k_cap), 1, -1):
            if R % cand == 0:
                k = cand
                break
        if k > 1:
            x2 = x2.reshape(R // k, k * D)
            g2 = jnp.tile(gamma, k)
    R2, D2 = x2.shape
    g2 = g2.reshape(1, D2)

    nelems = x.size
    cost = pl.CostEstimate(
        flops=nelems,
        transcendentals=0,
        bytes_accessed=nelems * x_item + nelems * out_item + D * g_item,
    )

    row_bytes = D2 * max_item
    if row_align * row_bytes <= target_tile_bytes:
        # ---- main path: 1-D row grid, full-width rows, gamma fully resident in VMEM ----
        tile_rows = max(row_align, (target_tile_bytes // row_bytes) // row_align * row_align)
        tile_rows = min(tile_rows, pl.cdiv(R2, row_align) * row_align)
        n_row_groups = pl.cdiv(R2, row_align)
        if is_multicore and n_row_groups >= 2:
            # Ensure >= 2 grid steps so both TensorCores (v7x megacore) get work.
            tile_rows = min(tile_rows, pl.cdiv(n_row_groups, 2) * row_align)
        grid = (pl.cdiv(R2, tile_rows),)  # ragged last block: OOB reads padded, stores masked
        in_specs = [
            pl.BlockSpec((tile_rows, D2), lambda i: (i, 0)),
            # gamma: full array resident in VMEM (one DMA, no per-step re-stream).
            pl.BlockSpec(memory_space=pltpu.MemorySpace.VMEM),
        ]
        out_specs = pl.BlockSpec((tile_rows, D2), lambda i: (i, 0))
        dims = ("parallel",)
        needed = 2 * tile_rows * D2 * (x_item + out_item) + 8 * pl.cdiv(D2, 128) * 128 * g_item
    else:
        # ---- large-D escape hatch: 2-D grid (D-blocks outer, rows inner), gamma blocked --
        tile_d = max(128, min(pl.cdiv(D2, 128) * 128,
                              (target_tile_bytes // (row_align * max_item)) // 128 * 128))
        tile_rows = max(row_align,
                        (target_tile_bytes // (tile_d * max_item)) // row_align * row_align)
        tile_rows = min(tile_rows, pl.cdiv(R2, row_align) * row_align)
        grid = (pl.cdiv(D2, tile_d), pl.cdiv(R2, tile_rows))  # D outer so gamma isn't re-streamed per row block
        in_specs = [
            pl.BlockSpec((tile_rows, tile_d), lambda j, i: (i, j)),
            pl.BlockSpec((1, tile_d), lambda j, i: (0, j)),
        ]
        out_specs = pl.BlockSpec((tile_rows, tile_d), lambda j, i: (i, j))
        dims = ("parallel", "parallel")
        needed = 2 * tile_rows * tile_d * (x_item + out_item) + 2 * tile_d * g_item

    # Double-buffered in + out tiles can exceed the scoped-VMEM default (16/32 MiB) with
    # the larger generation-tuned tiles; raise the ceiling explicitly, capped well under
    # every generation's physical VMEM (64 MiB per TC on v7x).
    vmem_limit = min(48 << 20, max(32 << 20, needed + (8 << 20)))

    out = pl.pallas_call(
        _layer_scale_kernel,
        out_shape=jax.ShapeDtypeStruct((R2, D2), out_dtype),
        grid_spec=pltpu.PrefetchScalarGridSpec(
            num_scalar_prefetch=0,
            grid=grid,
            in_specs=in_specs,
            out_specs=out_specs,
        ),
        compiler_params=pltpu.CompilerParams(
            dimension_semantics=dims,
            vmem_limit_bytes=vmem_limit,
        ),
        cost_estimate=cost,
    )(x2, g2)

    return out.reshape(orig_shape)


if __name__ == "__main__":
    key = jax.random.PRNGKey(0)
    B, N, D = 2, 8, 32
    init_values = 1e-5

    x = jax.random.normal(key, (B, N, D), dtype=jnp.float32)
    # Deterministic parameter init, matching nn.Parameter(init_values * torch.ones(dim)).
    gamma = init_values * jnp.ones((D,), dtype=jnp.float32)

    # TODO(synk): inplace=True (x.mul_) has no JAX equivalent (immutable arrays); the
    # out-of-place result below is numerically identical to the reference forward.
    y = jax.block_until_ready(layer_scale(x, gamma))
    ref = x * gamma
    assert y.shape == x.shape and y.dtype == ref.dtype
    assert jnp.array_equal(y, ref), "mismatch vs reference"

    # Exercise the partial lane-dense fold (R % k != 0) and the in-kernel mixed-dtype cast.
    xb = jax.random.normal(key, (2, 9, D), dtype=jnp.bfloat16)
    yb = jax.block_until_ready(layer_scale(xb, gamma))
    refb = xb * gamma
    assert yb.shape == xb.shape and yb.dtype == refb.dtype
    assert jnp.array_equal(yb, refb), "mismatch vs reference (mixed dtype / partial fold)"

    print("KERNEL_OK")
</pallas_src>

<mosaic_0001>
module attributes {stable_mosaic.version = 11 : i64} {
  func.func @_layer_scale_kernel(%arg0: i32, %arg1: memref<8x128xf32, #tpu.memory_space<vmem>>, %arg2: memref<1x128xf32, #tpu.memory_space<vmem>>, %arg3: memref<8x128xf32, #tpu.memory_space<vmem>>) attributes {dimension_semantics = [#tpu.dimension_semantics<parallel>], iteration_bounds = array<i64: 1>, scalar_prefetch = 0 : i64, scratch_operands = 0 : i64, tpu.core_type = #tpu.core_type<tc>, window_params = [{transform_indices = @transform_0, window_bounds = array<i64: 8, 128>}, {pipeline_mode = #tpu.pipeline_mode<synchronous>, transform_indices = @transform_1, window_bounds = array<i64: 1, 128>}, {transform_indices = @transform_2, window_bounds = array<i64: 8, 128>}]} {
    %c0 = arith.constant 0 : index
    %c0_0 = arith.constant 0 : index
    %0 = vector.load %arg1[%c0, %c0_0] : memref<8x128xf32, #tpu.memory_space<vmem>>, vector<8x128xf32>
    %c0_1 = arith.constant 0 : index
    %c0_2 = arith.constant 0 : index
    %1 = vector.load %arg2[%c0_1, %c0_2] : memref<1x128xf32, #tpu.memory_space<vmem>>, vector<1x128xf32>
    %2 = vector.broadcast %1 : vector<1x128xf32> to vector<8x128xf32>
    %3 = arith.mulf %0, %2 : vector<8x128xf32>
    %c0_3 = arith.constant 0 : index
    %c0_4 = arith.constant 0 : index
    %4 = vector.load %arg3[%c0_3, %c0_4] : memref<8x128xf32, #tpu.memory_space<vmem>>, vector<8x128xf32>
    tpu.vector_store %arg3[%c0_3, %c0_4], %3 {strides = array<i32>} : memref<8x128xf32, #tpu.memory_space<vmem>>, vector<8x128xf32>,
    return
  }
  func.func @transform_0(%arg0: i32) -> (i32, i32) {
    %c0_i32 = arith.constant 0 : i32
    %c0_i32_0 = arith.constant 0 : i32
    return %arg0, %c0_i32 : i32, i32
  }
  func.func @transform_1(%arg0: i32) -> (i32, i32) {
    %c0_i32 = arith.constant 0 : i32
    %c0_i32_0 = arith.constant 0 : i32
    %c0_i32_1 = arith.constant 0 : i32
    return %c0_i32, %c0_i32_0 : i32, i32
  }
  func.func @transform_2(%arg0: i32) -> (i32, i32) {
    %c0_i32 = arith.constant 0 : i32
    %c0_i32_0 = arith.constant 0 : i32
    return %arg0, %c0_i32 : i32, i32
  }
}

</mosaic_0001>

<bundles_post_ra>
// kernel: tpu_custom_call.1
= control target key start
LH: loop header
LB: loop body
LE: loop exit
PB: predicated region body
PF: predicated region fallthrough
CT: control target
= control target key end

     0   :  { %7 = vsyncpa [#allocation3], 0  ;;  %s182_s0 = inlined_call_operand.hbm [shape: f32[4,128], index: 0, kind: input, shape index: {}]   ;;  %s183_s1 = inlined_call_operand.hbm [shape: f32[1,128], index: 1, kind: input, shape index: {}]   ;;  %s184_s2 = inlined_call_operand.hbm [shape: f32[4,128], index: 2, kind: output, shape index: {}]  }
   0x1   :  { %8 = vsyncpa [#allocation6], 0 }
   0x2   :  { %9 = vsyncpa [#allocation4], 0 }
   0x3   :  { %13 = vsyncadd [#allocation3], 64  ;;  %s14_s11 = sshll.u32 %s182_s0, 4  ;;  %s153_s12 = smov [#allocation2]   ;;  %s15_s11 = int_to_ptr.hbm [resolvable:$true] %s14_s11 }
   0x4   :  { %s16_s13 = sshll.u32 %s153_s12, 4  ;;  %s28_s16 = sshll.u32 %s183_s1, 4  ;;  %s17_s13 = int_to_ptr.vmem [resolvable:$true] %s16_s13  ;;  %s29_s16 = int_to_ptr.hbm [resolvable:$true] %s28_s16 }
   0x5   :  { %s154_s17 = smov 64   ;;  %s155_s18 = smov 4  }
   0x6   :  { %22 = dma.hbm_to_vmem [thread:$0]  %s15_s11, 64, %s17_s13, [#allocation3], %s154_s17, %s154_s17, %s155_s18  }
   0x7   :  { %s156_s19 = smov [#allocation5]  }
   0x8   :  { %s30_s20 = sshll.u32 %s156_s19, 4  ;;  %s31_s20 = int_to_ptr.vmem [resolvable:$true] %s30_s20 }
   0x9   :  { %33 = dma.hbm_to_vmem [thread:$0]  %s29_s16, 16, %s31_s20, [#allocation6]  }
   0xa   :  { %147 = dma.done.wait [#allocation3], 128  }
   0xb   :  { %148 = vsyncadd [#allocation3], 4294967168 }
   0xc   :  { %149 = dma.done.wait [#allocation6], 16  }
   0xd   :  { %150 = vsyncadd [#allocation6], 4294967280  ;;  %v42_v0 = vld [vmem:[#allocation2] sm:$0xff]  ;;  %v74_v1 = vld [vmem:[#allocation5] ss:$0 sm:$0xff] }
   0xe   :  { %v47_v2 = vmul.f32 %v74_v1, %v42_v0 }
  0x10   :  { %48 = vst [vmem:[#allocation7] sm:$0xff] %v47_v2 }
  0x11   :  { %52 = vsyncadd [#allocation4], 64  ;;  %s55_s1 = sshll.u32 %s184_s2, 4  ;;  %s157_s22 = smov [#allocation7]   ;;  %s56_s1 = int_to_ptr.hbm [resolvable:$true] %s55_s1 }
  0x12   :  { %s53_s23 = sshll.u32 %s157_s22, 4  ;;  %s54_s23 = int_to_ptr.vmem [resolvable:$true] %s53_s23 }
  0x13   :  { %61 = dma.vmem_to_hbm [thread:$0]  %s54_s23, 64, %s56_s1, [#allocation4], %s154_s17, %s154_s17, %s155_s18  }
  0x14   :  { %151 = dma.done.wait [#allocation4], 128  }
  0x15   :  { %152 = vsyncadd [#allocation4], 4294967168 }
  0x16   :  { %66 = vsyncpa [#allocation3], 1 }
  0x17   :  { %67 = vsyncpa [#allocation6], 1 }
  0x18   :  { %68 = vsyncpa [#allocation4], 1 }

</bundles_post_ra>
